<compile_context>
chip_gen: v7x
topology: tpu7x:2x2x1
jax: 0.10.0
libtpu: 0.0.40
codegen_flags: <defaults>
</compile_context>

<pallas_src>
import functools

import jax
import jax.numpy as jnp
from jax.experimental import pallas as pl
from jax.experimental.pallas import tpu as pltpu


def _gap_kernel(x_ref, o_ref, acc_ref, *, inv_hw):
    # x_ref : (1, TC, TL) block of the (N, C, H*W) view, resident in VMEM.
    # o_ref : (1, 1, TC) block of the (N, 1, C) output.
    # acc_ref: (1, TC) f32 accumulator, resident across the HW-reduction axis.
    j = pl.program_id(2)

    @pl.when(j == 0)
    def _():
        acc_ref[...] = jnp.zeros_like(acc_ref)

    # Partial spatial sum for this block, accumulated in f32 (block-sized
    # upcast only — never the whole tensor).
    acc_ref[...] += jnp.sum(x_ref[...].astype(jnp.float32), axis=2)

    @pl.when(j == pl.num_programs(2) - 1)
    def _():
        mean = acc_ref[...] * inv_hw                  # (1, TC), f32
        o_ref[...] = mean[None].astype(o_ref.dtype)   # (1, 1, TC)


def _pick_tile(dim, granule, cap):
    """Largest divisor of `dim` that is a multiple of `granule` and <= cap.

    Falls back to the full `dim` (always a legal block size) when no such
    divisor exists (e.g. dim is not a multiple of `granule`).
    """
    if cap >= dim:
        return dim
    best = None
    d = granule
    while d <= cap:
        if dim % d == 0:
            best = d
        d += granule
    return best if best is not None else dim


def global_avg_pool2d(x, *, target_block_bytes=2 * 1024 * 1024):
    """Equivalent of adaptive_avg_pool2d(x, 1).view(N, -1) for NCHW input."""
    n, c, h, w = x.shape
    hw = h * w
    x3 = x.reshape(n, c, hw)          # free view of contiguous NCHW
    itemsize = jnp.dtype(x.dtype).itemsize

    # Lane tile over the flattened spatial axis: a multiple of 128 dividing H*W
    # (or the full extent), sized so one (1, C, TL) block is ~target_block_bytes.
    tl = _pick_tile(hw, 128, max(128, target_block_bytes // max(1, c * itemsize)))

    # Channel tile: keep full C unless the block is still too big and C can be
    # split into lane-aligned (multiple-of-128) pieces, which keeps the output
    # blocks legal and lane-dense.
    tc = c
    if c * tl * itemsize > 2 * target_block_bytes and c % 128 == 0:
        tc = _pick_tile(c, 128,
                        max(128, (2 * target_block_bytes) // max(1, tl * itemsize)))

    grid = (n, c // tc, hw // tl)
    inv_hw = 1.0 / float(hw)

    out3 = pl.pallas_call(
        functools.partial(_gap_kernel, inv_hw=inv_hw),
        out_shape=jax.ShapeDtypeStruct((n, 1, c), x.dtype),
        grid_spec=pltpu.PrefetchScalarGridSpec(
            num_scalar_prefetch=0,
            grid=grid,
            in_specs=[pl.BlockSpec((1, tc, tl), lambda b, ci, j: (b, ci, j))],
            out_specs=pl.BlockSpec((1, 1, tc), lambda b, ci, j: (b, 0, ci)),
            scratch_shapes=[pltpu.VMEM((1, tc), jnp.float32)],
        ),
        compiler_params=pltpu.CompilerParams(
            # N / C tiles are independent (megacore-shardable on v7x); the
            # spatial reduction axis is last and "arbitrary" so the
            # accumulator / output block stays resident across it.
            dimension_semantics=("parallel", "parallel", "arbitrary")),
    )(x3)
    return out3.reshape(n, c)


if __name__ == "__main__":
    key = jax.random.PRNGKey(0)

    # NCHW input, consistent with the PyTorch module's conv-style input.
    x = jax.random.normal(key, (2, 4, 16, 16), dtype=jnp.float32)
    out = jax.block_until_ready(global_avg_pool2d(x))
    ref = jnp.mean(x, axis=(2, 3))
    assert out.shape == (2, 4), out.shape
    assert jnp.allclose(out, ref, atol=1e-5, rtol=1e-5), "mismatch vs reference"

    # Second check with a tiny block budget to exercise the multi-step
    # spatial-reduction (accumulator) path of the same kernel, in bf16.
    x2 = jax.random.normal(jax.random.PRNGKey(1), (2, 16, 32, 32), dtype=jnp.bfloat16)
    out2 = jax.block_until_ready(global_avg_pool2d(x2, target_block_bytes=16 * 1024))
    ref2 = jnp.mean(x2.astype(jnp.float32), axis=(2, 3)).astype(jnp.bfloat16)
    assert out2.shape == (2, 16), out2.shape
    assert jnp.allclose(out2.astype(jnp.float32), ref2.astype(jnp.float32),
                        atol=2e-2, rtol=2e-2), "mismatch vs reference (bf16)"

    print("KERNEL_OK")
</pallas_src>

<mosaic_0001>
module attributes {stable_mosaic.version = 11 : i64} {
  func.func @_gap_kernel(%arg0: i32, %arg1: i32, %arg2: i32, %arg3: memref<1x4x256xf32, #tpu.memory_space<vmem>>, %arg4: memref<1x1x4xf32, #tpu.memory_space<vmem>>, %arg5: memref<1x4xf32, #tpu.memory_space<vmem>>) attributes {dimension_semantics = [#tpu.dimension_semantics<parallel>, #tpu.dimension_semantics<parallel>, #tpu.dimension_semantics<arbitrary>], iteration_bounds = array<i64: 2, 1, 1>, scalar_prefetch = 0 : i64, scratch_operands = 1 : i64, tpu.core_type = #tpu.core_type<tc>, window_params = [{transform_indices = @transform_0, window_bounds = array<i64: 1, 4, 256>}, {transform_indices = @transform_1, window_bounds = array<i64: 1, 1, 4>}]} {
    %c0_i32 = arith.constant 0 : i32
    %0 = arith.cmpi eq, %arg2, %c0_i32 : i32
    %1 = arith.extui %0 : i1 to i32
    %c0_i32_0 = arith.constant 0 : i32
    %2 = arith.cmpi ne, %1, %c0_i32_0 : i32
    scf.if %2 {
      %cst_9 = arith.constant 0.000000e+00 : f32
      %11 = vector.broadcast %cst_9 : f32 to vector<1x4xf32>
      %c0_10 = arith.constant 0 : index
      %c0_11 = arith.constant 0 : index
      %12 = vector.load %arg5[%c0_10, %c0_11] : memref<1x4xf32, #tpu.memory_space<vmem>>, vector<1x4xf32>
      tpu.vector_store %arg5[%c0_10, %c0_11], %11 {strides = array<i32>} : memref<1x4xf32, #tpu.memory_space<vmem>>, vector<1x4xf32>,
    } else {
    }
    %c0 = arith.constant 0 : index
    %c0_1 = arith.constant 0 : index
    %3 = vector.load %arg5[%c0, %c0_1] : memref<1x4xf32, #tpu.memory_space<vmem>>, vector<1x4xf32>
    %c0_2 = arith.constant 0 : index
    %c0_3 = arith.constant 0 : index
    %c0_4 = arith.constant 0 : index
    %4 = vector.load %arg3[%c0_2, %c0_3, %c0_4] : memref<1x4x256xf32, #tpu.memory_space<vmem>>, vector<1x4x256xf32>
    %cst = arith.constant dense<0.000000e+00> : vector<1x4xf32>
    %5 = vector.multi_reduction <add>, %4, %cst [2] : vector<1x4x256xf32> to vector<1x4xf32>
    %6 = arith.addf %3, %5 : vector<1x4xf32>
    %c0_5 = arith.constant 0 : index
    %c0_6 = arith.constant 0 : index
    %7 = vector.load %arg5[%c0_5, %c0_6] : memref<1x4xf32, #tpu.memory_space<vmem>>, vector<1x4xf32>
    tpu.vector_store %arg5[%c0_5, %c0_6], %6 {strides = array<i32>} : memref<1x4xf32, #tpu.memory_space<vmem>>, vector<1x4xf32>,
    %c0_i32_7 = arith.constant 0 : i32
    %8 = arith.cmpi eq, %arg2, %c0_i32_7 : i32
    %9 = arith.extui %8 : i1 to i32
    %c0_i32_8 = arith.constant 0 : i32
    %10 = arith.cmpi ne, %9, %c0_i32_8 : i32
    scf.if %10 {
      %c0_9 = arith.constant 0 : index
      %c0_10 = arith.constant 0 : index
      %11 = vector.load %arg5[%c0_9, %c0_10] : memref<1x4xf32, #tpu.memory_space<vmem>>, vector<1x4xf32>
      %cst_11 = arith.constant 3.906250e-03 : f32
      %12 = vector.broadcast %cst_11 : f32 to vector<1x4xf32>
      %13 = arith.mulf %11, %12 : vector<1x4xf32>
      %14 = vector.shape_cast %13 : vector<1x4xf32> to vector<1x1x4xf32>
      %c0_12 = arith.constant 0 : index
      %c0_13 = arith.constant 0 : index
      %c0_14 = arith.constant 0 : index
      %15 = vector.load %arg4[%c0_12, %c0_13, %c0_14] : memref<1x1x4xf32, #tpu.memory_space<vmem>>, vector<1x1x4xf32>
      tpu.vector_store %arg4[%c0_12, %c0_13, %c0_14], %14 {strides = array<i32>} : memref<1x1x4xf32, #tpu.memory_space<vmem>>, vector<1x1x4xf32>,
    } else {
    }
    return
  }
  func.func @transform_0(%arg0: i32, %arg1: i32, %arg2: i32) -> (i32, i32, i32) {
    %c0_i32 = arith.constant 0 : i32
    return %arg0, %arg1, %arg2 : i32, i32, i32
  }
  func.func @transform_1(%arg0: i32, %arg1: i32, %arg2: i32) -> (i32, i32, i32) {
    %c0_i32 = arith.constant 0 : i32
    %c0_i32_0 = arith.constant 0 : i32
    return %arg0, %c0_i32, %arg1 : i32, i32, i32
  }
}

</mosaic_0001>

<bundles_post_ra>
// kernel: tpu_custom_call.1
= control target key start
LH: loop header
LB: loop body
LE: loop exit
PB: predicated region body
PF: predicated region fallthrough
CT: control target
= control target key end

     0   :  { %6 = vsyncpa [#allocation4], 0  ;;  %s735_s0 = inlined_call_operand.hbm [shape: f32[2,4,256], index: 0, kind: input, shape index: {}]   ;;  %s736_s1 = inlined_call_operand.hbm [shape: f32[2,1,4], index: 1, kind: output, shape index: {}]  }
   0x1   :  { %8 = vsyncpa [#allocation4 + $0x1], 0 }
   0x2   :  { %9 = vsyncpa [#allocation5], 0 }
   0x3   :  { %11 = vsyncpa [#allocation5 + $0x1], 0  ;;  %s559_s6 = smov 0   ;;  %s561_s7 = smov 0  }
   0x4   :  { %s563_s8 = smov 0   ;;  %s565_s9 = smov 0  }
   0x5   :  { %s567_s10 = smov 0   ;;  %s569_s11 = smov 0  }
   0x6 LB: > { %s350_s12 = sadd.s32 4294967295, %s542_s11   ;;  %s351_s13 = sadd.s32 4294967294, %s542_s11   ;;  %s542_s11 = sphi %s569_s11, %s17_s11   ;;  %s538_s10 = sphi %s567_s10, %s752_s10   ;;  %s534_s9 = sphi %s565_s9, %s751_s9   ;;  %s530_s8 = sphi %s563_s8, %s750_s8   ;;  %s526_s7 = sphi %s561_s7, %s749_s7   ;;  %s522_s6 = sphi %s559_s6, %s748_s6  }
   0x7   : > { %s36_s14 = sadd.s32 1, %s538_s10  ;;  %s47_s15 = sadd.s32 1, %s530_s8 }
   0x8   : > { %p38_p0 = scmp.ge.s32.totalorder %s36_s14, 2  ;;  %p54_p1 = scmp.ne.s32.totalorder %s530_s8, %s526_s7 }
   0x9   : > { %p55_p2 = scmp.eq.s32.totalorder %s542_s11, 0  ;;  %p60_p3 = scmp.ne.s32.totalorder %s526_s7, %s522_s6 }
   0xa   : > { %s754_s14 = smov (%p38_p0, %s36_s14), 0  ;;  %p61_p5 = scmp.eq.s32.totalorder %s350_s12, 0 }
   0xb   : > { %p600_p4 = por %p55_p2, %p54_p1  ;;  %s40_s17 = ssub.s32 %s538_s10, %s754_s14 }
   0xc   : > { %p86_p6 = scmp.eq.s32.totalorder %s350_s12, 1  ;;  %p45_p7 = scmp.eq.s32.totalorder %s40_s17, 0 }
   0xd   : > { %p606_p8 = por %p61_p5, %p60_p3  ;;  %p92_p10 = scmp.eq.s32.totalorder %s351_s13, 1 }
   0xe   : > { %p610_p9 = por %p86_p6, %p54_p1  ;;  %p375_p13 = scmp.lt.s32.totalorder %s542_s11, 2 }
   0xf   : > { %s615_s20 = scalar_select %p45_p7, %s530_s8, %s47_s15  }
  0x10   : > { %s740_s19 = scalar_select %p610_p9, 1, 0 }
  0x11   : > { %p617_p11 = por %p92_p10, %p60_p3  ;;  %s112_s22 = sand.u32 1, %s530_s8  }
  0x12   : > { %s354_s23 = sshll.u32 %s112_s22, 3  ;;  %s362_s24 = sshll.u32 %s538_s10, 7 }
  0x13   : > { %s741_s21 = scalar_select %p617_p11, 1, 0 }
  0x14   : > { %s628_s27 = scalar_lea.hbm %s735_s0, %s362_s24  ;;  %s116_s28 = scalar_lea.vmem [#allocation3], %s354_s23 }
  0x15   : > { %s128_s29 = sshll.u32 %s116_s28, 4  ;;  %p634_p0 = pnand %p375_p13, %p600_p4  ;;  %s630_s29 = int_to_ptr.vmem [resolvable:$true] %s128_s29 }
  0x16   : > { %s113_s2 = scalar_lea.sflag [#allocation4], %s112_s22  ;;  %s430_s3 = scalar_lea.hbm %s628_s27, 128 }
  0x17   : > { %p431_p3 = scmp.ne.s32.totalorder %s628_s27, %s430_s3  ;;  %p432_p5 = pneg %p634_p0 }
  0x18   : > { %s435_s12 = scalar_lea.hbm %s735_s0, 256  ;;  %p436_p4 = scmp.lt.u32.totalorder %s628_s27, %s735_s0 }
  0x19   : > { %p433_p6 = pnand %p432_p5, %p431_p3  ;;  %p437_p10 = scmp.lt.u32.totalorder %s435_s12, %s430_s3 }
  0x1a   : > { %p439_p12 = scmp.lt.u32.totalorder %s430_s3, %s628_s27 }
  0x1b   : > { %p434_p7 = pneg %p433_p6  ;;  %p438_p13 = por %p437_p10, %p436_p4 }
  0x1d   : > { %p440_p1 = por %p439_p12, %p438_p13 }
  0x1f   : > { %p441_p2 = pnand %p440_p1, %p434_p7 }
  0x21   : > { %444 = shalt.err (!%p441_p2)
}
  0x22   : > { %s445_s16 = scalar_lea.vmem %s630_s29, 128  ;;  %s544_s17 = smov [#allocation3]  }
  0x23   : > { %p446_p3 = scmp.ne.s32.totalorder %s630_s29, %s445_s16  ;;  %s450_s22 = sshll.u32 %s544_s17, 4  ;;  %s451_s22 = int_to_ptr.vmem [resolvable:$false] %s450_s22 }
  0x24   : > { %s452_s23 = scalar_lea.vmem %s451_s22, 256  ;;  %p453_p9 = scmp.lt.s32.totalorder %s630_s29, %s451_s22 }
  0x25   : > { %p448_p6 = pnand %p446_p3, %p432_p5  ;;  %p454_p4 = scmp.lt.s32.totalorder %s452_s23, %s445_s16 }
  0x27   : > { %p449_p11 = pneg %p448_p6  ;;  %p455_p10 = por %p454_p4, %p453_p9 }
  0x29   : > { %p456_p12 = pnand %p455_p10, %p449_p11 }
  0x2b   : > { %459 = shalt.err (!%p456_p12)
}
  0x2c   : > { %370 = dma.hbm_to_vmem [thread:$0]  (!%p634_p0), %s628_s27, 128, %s630_s29, %s113_s2  }
  0x2d   : > { %p743_p1 = scmp.lt.s32.totalorder %s542_s11, 3  ;;  %p744_p2 = scmp.ge.s32.totalorder %s542_s11, 1 }
  0x2f   : > { %p134_p5 = pnand %p744_p2, %p743_p1 }
  0x30   : > { %s670_s24 = sand.u32 (!%p134_p5), 1, %s526_s7  }
  0x31   : > { %137 = sbr.rel (%p134_p5) target bundleno = 375 (0x177), region = 24  ;;  %s358_s25 = sshll.u32 (!%p134_p5), %s670_s24, 3 }
  0x32   : > { %s140_s26 = scalar_lea.sflag (!%p134_p5), [#allocation4], %s670_s24  ;;  %s143_s28 = scalar_lea.vmem (!%p134_p5), [#allocation3], %s358_s25 }
  0x38   : > { %513 = dma.done.wait (%p606_p8), %s140_s26, 128  }
  0x39   : > { %515 = vsyncadd (%p606_p8), %s140_s26, 4294967168  ;;  %vm173_vm0 = vcmask 1043456   ;;  %v169_v0 = vld [vmem:[%s143_s28] sm:$0xff]  ;;  %v545_v5 = vmov 0   ;;  %v180_v6 = vlaneseq  ;;  %vm166_vm1 = vcmask 24576   ;;  %s359_s18 = sshll.u32 %s534_s9, 4 }
  0x3a   : > { %v171_v1 = vcombine.high %v169_v0, %v169_v0  ;;  %v174_v2 = vsel %vm173_vm0, %v169_v0, 0.0  ;;  %428 = vset.pattern.permute.xlu0 %v545_v5  ;;  %v546_v9 = vmov 0.0   ;;  %v547_v11 = vmov 1966171168   ;;  %s160_s27 = scalar_lea.vmem [#allocation6], %s670_s24  ;;  %s685_s3 = scalar_lea.hbm %s736_s1, %s359_s18 }
  0x3b   : > { %v181_v7 = vshrl.u32 %v180_v6, 7  ;;  %v224_v8 = vand.u32 127, %v180_v6  ;;  %167 = vst.msk [vmem:[#allocation2] sm:$0x1] %vm166_vm1, %v546_v9  ;;  %v199_v12 = vunpack.c.l.s4 %v547_v11  ;;  %s267_s29 = sshll.u32 %s160_s27, 4  ;;  %s254_s4 = scalar_lea.sflag [#allocation5], %s670_s24  ;;  %s687_s29 = int_to_ptr.vmem [resolvable:$true] %s267_s29 }
  0x3c   : > { %v175_v3 = vsel %vm173_vm0, %v171_v1, 0.0  ;;  %s460_s5 = scalar_lea.vmem %s687_s29, 16  ;;  %p745_p9 = scmp.ne.s32.totalorder %s740_s19, 0 }
  0x3d   : > { %v176_v4 = vadd.f32 %v175_v3, %v174_v2  ;;  %v227_v10 = vsub.s32 %v224_v8, %v181_v7  ;;  %v200_v13 = vunpack.c.0.s8 %v199_v12  ;;  %v182_v14 = vsub.s32 0, %v181_v7  ;;  %p461_p8 = scmp.ne.s32.totalorder %s687_s29, %s460_s5  ;;  %s548_s9 = smov [#allocation6]  }
  0x3e   : > { %v186_v15 = vsub.s32 1, %v181_v7  ;;  %v190_v16 = vsub.s32 2, %v181_v7  ;;  %v194_v17 = vsub.s32 3, %v181_v7  ;;  %s464_s12 = sshll.u32 %s548_s9, 4  ;;  %s465_s12 = int_to_ptr.vmem [resolvable:$false] %s464_s12 }
  0x3f   : > { %177 = vadd.xlane.f32.xlu0 %v176_v4  ;;  %v203_v19 = vsub.s32 %v200_v13, %v181_v7  ;;  %p462_p11 = pnand %p461_p8, %p745_p9  ;;  %s466_s13 = scalar_lea.vmem %s465_s12, 32 }
  0x40   : > { %p467_p7 = scmp.lt.s32.totalorder %s687_s29, %s465_s12  ;;  %p468_p13 = scmp.lt.s32.totalorder %s466_s13, %s460_s5 }
  0x41   : > { %p463_p0 = pneg %p462_p11 }
  0x42   : > { %v168_v33 = vld [vmem:[#allocation2] sm:$0x1]  ;;  %p469_p3 = por %p468_p13, %p467_p7 }
  0x44   : > { %p470_p6 = pnand %p469_p3, %p463_p0 }
  0xcc   : > { %v178_v18 = vpop.xlane.xlu0 %177 }
  0xcd   : > { %v183_v20 = vrot.slane %v178_v18, %v182_v14  ;;  %v187_v21 = vrot.slane %v178_v18, %v186_v15  ;;  %v191_v22 = vrot.slane %v178_v18, %v190_v16  ;;  %v195_v23 = vrot.slane %v178_v18, %v194_v17 }
  0xcf   : > { %v196_v24 = vcombine.low %v183_v20, %v187_v21  ;;  %v197_v25 = vcombine.low %v191_v22, %v195_v23 }
  0xd1   : > { %v204_v26 = vrot.slane %v196_v24, %v203_v19  ;;  %v211_v27 = vrot.slane %v197_v25, %v203_v19 }
  0xd3   : > { %v212_v28 = vcombine.low %v204_v26, %v211_v27 }
  0xd5   : > { %v219_v29 = vrot.slane %v212_v28, %v203_v19 }
  0xd7   : > { %221 = vperm.xlu0 %428, %v219_v29  }
 0x156   : > { %v222_v30 = vpop.permute.xlu0 %221 }
 0x157   : > { %v228_v31 = vrot.slane %v222_v30, %v227_v10 }
 0x159   : > { %v235_v32 = vrot.slane %v228_v31, %v203_v19 }
 0x15b   : > { %v242_v34 = vrot.slane %v235_v32, %v203_v19 }
 0x15d   : > { %v244_v35 = vadd.f32 %v242_v34, %v168_v33 }
 0x15f   : > { %246 = vst.msk [vmem:[#allocation2] sm:$0x1] %vm166_vm1, %v244_v35 }
 0x166   : > { %v250_v36 = vld [vmem:[#allocation2] sm:$0x1] }
 0x167   : > { %v251_v37 = vmul.f32 0.00390625, %v250_v36 }
 0x169   : > { %252 = vst.msk [vmem:[%s160_s27] sm:$0x1] %vm166_vm1, %v251_v37 }
 0x16a   : > { %473 = shalt.err (!%p470_p6)
}
 0x16b   : > { %s474_s15 = scalar_lea.hbm %s685_s3, 16  ;;  %s478_s22 = scalar_lea.hbm %s736_s1, 32 }
 0x16c   : > { %p475_p4 = scmp.ne.s32.totalorder %s685_s3, %s474_s15  ;;  %p479_p1 = scmp.lt.u32.totalorder %s685_s3, %s736_s1 }
 0x16d   : > { %p480_p2 = scmp.lt.u32.totalorder %s478_s22, %s474_s15  ;;  %p482_p8 = scmp.lt.u32.totalorder %s474_s15, %s685_s3 }
 0x16e   : > { %p476_p10 = pnand %p475_p4, %p745_p9 }
 0x16f   : > { %p481_p5 = por %p480_p2, %p479_p1 }
 0x170   : > { %p477_p12 = pneg %p476_p10 }
 0x171   : > { %p483_p11 = por %p482_p8, %p481_p5 }
 0x173   : > { %p484_p0 = pnand %p483_p11, %p477_p12 }
 0x175   : > { %487 = shalt.err (!%p484_p0)
}
 0x176   : > { %365 = dma.vmem_to_hbm [thread:$0]  (%p745_p9), %s687_s29, 16, %s685_s3, %s254_s4  }
 0x177 PF: > { %s279_s25 = sand.u32 1, %s522_s6   ;;  %p746_p7 = scmp.ne.s32.totalorder %s741_s21, 0 }
 0x178   : > { %p747_p13 = scmp.ge.s32.totalorder %s542_s11, 2  ;;  %s280_s26 = scalar_lea.sflag [#allocation5], %s279_s25 }
 0x17a   : > { %p372_p3 = pnand %p747_p13, %p746_p7 }
 0x17c   : > { %517 = dma.done.wait (!%p372_p3), %s280_s26, 16  }
 0x17d   : > { %519 = vsyncadd (!%p372_p3), %s280_s26, 4294967280  ;;  %s17_s11 = sadd.s32 1, %s542_s11   ;;  %s748_s6 = smov %s526_s7 }
 0x17e   : > { %p14_p6 = scmp.ge.s32.totalorder %s17_s11, 4   ;;  %s749_s7 = smov %s530_s8 }
 0x17f   : > { %s750_s8 = smov %s615_s20  ;;  %s751_s9 = smov %s538_s10 }
 0x180   : > { %s752_s10 = smov %s754_s14  ;;  %16 = sbr.rel (!%p14_p6) target bundleno = 6 (0x6), region = 77 }
 0x187   :  { %284 = vsyncpa [#allocation4], 1 }
 0x188   :  { %286 = vsyncpa [#allocation4 + $0x1], 1 }
 0x189   :  { %287 = vsyncpa [#allocation5], 1 }
 0x18a   :  { %289 = vsyncpa [#allocation5 + $0x1], 1 }

</bundles_post_ra>
